<compile_context>
chip_gen: v5e
topology: v5e:2x2
jax: 0.10.0
libtpu: 0.0.40
codegen_flags: <defaults>
</compile_context>

<pallas_src>
import jax
import jax.numpy as jnp
from jax import lax
from jax.experimental import pallas as pl
from jax.experimental.pallas import tpu as pltpu

EPS = 1e-5


# ----------------------------------------------------------------------------
# Pallas kernel: one batch element per grid step, everything channel-major.
# ----------------------------------------------------------------------------
def _dualatt_kernel(slab_ref,     # (1, 9*Cin, HW)   im2col slab for this sample
                    w3_ref,       # (Cout, 9*Cin)    3x3 conv weights, channel-major
                    scale3_ref,   # (Cout, 1)        folded BN scale   (c3x3rb)
                    bias3_ref,    # (Cout, 1)        folded BN bias (incl. conv bias)
                    ws1_ref,      # (C4, Cout)       spatialAttn conv1 (no bias)
                    ssc_ref,      # (C4, 1)          spatialAttn BN scale
                    sbi_ref,      # (C4, 1)          spatialAttn BN bias
                    ws2_ref,      # (C4, 1)          spatialAttn conv2 weights
                    bs2_ref,      # (1, 1)           spatialAttn conv2 bias
                    wc1_ref,      # (Cout, C16)      channelAttn conv1
                    bc1_ref,      # (1, C16)         channelAttn conv1 bias
                    wc2_ref,      # (Cout, C16)      channelAttn conv2 (transposed)
                    bc2_ref,      # (Cout, 1)        channelAttn conv2 bias
                    out_ref):     # (1, Cout, HW)    channel-major, lane-dense
    slab = slab_ref[0]                                          # (9*Cin, HW)

    # --- c3x3rb: 3x3 conv as ONE K=9*Cin MXU matmul, channel-major output ---
    conv = jnp.dot(w3_ref[...], slab, preferred_element_type=jnp.float32)
    fused = jnp.maximum(conv * scale3_ref[...] + bias3_ref[...], 0.0)   # (Cout, HW)

    # --- spatialAttn: 1x1 conv -> BN -> ReLU -> (C4 -> 1) -> Sigmoid ---------
    s1 = jnp.dot(ws1_ref[...], fused, preferred_element_type=jnp.float32)
    s1 = jnp.maximum(s1 * ssc_ref[...] + sbi_ref[...], 0.0)             # (C4, HW)
    # C4 -> 1 projection kept off the MXU: broadcast-mul + sublane reduce.
    s2 = jax.nn.sigmoid(jnp.sum(s1 * ws2_ref[...], axis=0, keepdims=True)
                        + bs2_ref[...])                                 # (1, HW)

    # --- channelAttn: GAP -> 1x1 -> ReLU -> 1x1 -> Sigmoid (tiny, VPU/XLU) ---
    pooled = jnp.mean(fused, axis=1, keepdims=True)                     # (Cout, 1)
    c1 = jnp.maximum(jnp.sum(pooled * wc1_ref[...], axis=0, keepdims=True)
                     + bc1_ref[...], 0.0)                               # (1, C16)
    c2 = jax.nn.sigmoid(jnp.sum(c1 * wc2_ref[...], axis=1, keepdims=True)
                        + bc2_ref[...])                                 # (Cout, 1)

    # --- fea = (spatial + 1) * (fused * channel); already channel-major ------
    out_ref[0] = (s2 + 1.0) * (fused * c2)


# ----------------------------------------------------------------------------
# Wrapper
# ----------------------------------------------------------------------------
def dualatt_conblock(x_nchw, p):
    """x_nchw: (N, Cin, H, W) float32 -> (N, Cout, H, W) float32."""
    N, Cin, H, W = x_nchw.shape
    Cout = p["w3"].shape[0]
    C4 = p["ws1"].shape[0]
    C16 = p["wc1"].shape[1]
    HW = H * W

    # im2col in the wrapper, fused by XLA with the pad. k ordering: (dy, dx, cin),
    # lane ordering: (h, w) -- matches w3 rows and the (Cout, HW) kernel output.
    xpad = jnp.pad(x_nchw, ((0, 0), (0, 0), (1, 1), (1, 1)))
    taps = [xpad[:, :, dy:dy + H, dx:dx + W] for dy in range(3) for dx in range(3)]
    slab = jnp.stack(taps, axis=1).reshape(N, 9 * Cin, HW)      # (N, 9*Cin, HW)

    # Weights/bias blocks: constant index_map -> stay VMEM-resident across steps.
    res = lambda shape: pl.BlockSpec(shape, lambda n: (0,) * len(shape))

    out = pl.pallas_call(
        _dualatt_kernel,
        out_shape=jax.ShapeDtypeStruct((N, Cout, HW), jnp.float32),
        grid=(N,),
        in_specs=[
            pl.BlockSpec((1, 9 * Cin, HW), lambda n: (n, 0, 0)),
            res((Cout, 9 * Cin)),
            res((Cout, 1)),
            res((Cout, 1)),
            res((C4, Cout)),
            res((C4, 1)),
            res((C4, 1)),
            res((C4, 1)),
            res((1, 1)),
            res((Cout, C16)),
            res((1, C16)),
            res((Cout, C16)),
            res((Cout, 1)),
        ],
        out_specs=pl.BlockSpec((1, Cout, HW), lambda n: (n, 0, 0)),
        compiler_params=pltpu.CompilerParams(
            dimension_semantics=("parallel",)),   # v7x: one sample per TensorCore
    )(slab, p["w3"], p["scale3"], p["bias3"],
      p["ws1"], p["ssc"], p["sbi"], p["ws2"], p["bs2"],
      p["wc1"], p["bc1"], p["wc2"], p["bc2"])

    # Output already channel-major: only a free reshape back to NCHW.
    return out.reshape(N, Cout, H, W)


# ----------------------------------------------------------------------------
# Pure-JAX reference (mirrors the PyTorch module, BN in eval mode)
# ----------------------------------------------------------------------------
def ref_forward(x_nchw, raw):
    x = jnp.transpose(x_nchw, (0, 2, 3, 1))  # NHWC
    conv = lax.conv_general_dilated(
        x, raw["w3_hwio"], (1, 1), "SAME",
        dimension_numbers=("NHWC", "HWIO", "NHWC")) + raw["b3"]
    fused = jax.nn.relu(
        (conv - raw["m3"]) / jnp.sqrt(raw["v3"] + EPS) * raw["g3"] + raw["be3"])

    s1 = jnp.einsum("nhwc,cd->nhwd", fused, raw["ws1"])
    s1 = jax.nn.relu(
        (s1 - raw["ms1"]) / jnp.sqrt(raw["vs1"] + EPS) * raw["gs1"] + raw["bes1"])
    s2 = jax.nn.sigmoid(jnp.einsum("nhwd,de->nhwe", s1, raw["ws2"]) + raw["bs2"])

    pooled = jnp.mean(fused, axis=(1, 2), keepdims=True)
    c1 = jax.nn.relu(jnp.einsum("nhwc,cd->nhwd", pooled, raw["wc1"]) + raw["bc1"])
    c2 = jax.nn.sigmoid(jnp.einsum("nhwd,dc->nhwc", c1, raw["wc2"]) + raw["bc2"])

    fea = (s2 + 1.0) * (fused * c2)
    return jnp.transpose(fea, (0, 3, 1, 2))


# ----------------------------------------------------------------------------
# Deterministic parameter construction
# ----------------------------------------------------------------------------
def make_params(key, Cin, Cout):
    C4, C16 = Cout // 4, Cout // 16
    ks = jax.random.split(key, 20)
    n = lambda k, s, sc=0.1: (jax.random.normal(k, s, jnp.float32) * sc)

    raw = dict(
        # c3x3rb
        w3_hwio=n(ks[0], (3, 3, Cin, Cout)),
        b3=n(ks[1], (Cout,)),
        g3=1.0 + n(ks[2], (Cout,)),
        be3=n(ks[3], (Cout,)),
        m3=n(ks[4], (Cout,)),
        v3=0.5 + jnp.abs(n(ks[5], (Cout,))),
        # spatialAttn
        ws1=n(ks[6], (Cout, C4)),
        gs1=1.0 + n(ks[7], (C4,)),
        bes1=n(ks[8], (C4,)),
        ms1=n(ks[9], (C4,)),
        vs1=0.5 + jnp.abs(n(ks[10], (C4,))),
        ws2=n(ks[11], (C4, 1)),
        bs2=n(ks[12], (1,)),
        # channelAttn
        wc1=n(ks[13], (Cout, C16)),
        bc1=n(ks[14], (C16,)),
        wc2=n(ks[15], (C16, Cout)),
        bc2=n(ks[16], (Cout,)),
    )

    # fold BN (eval mode) into per-channel scale/bias for the kernel
    scale3 = raw["g3"] / jnp.sqrt(raw["v3"] + EPS)
    bias3 = scale3 * (raw["b3"] - raw["m3"]) + raw["be3"]
    ssc = raw["gs1"] / jnp.sqrt(raw["vs1"] + EPS)
    sbi = raw["bes1"] - ssc * raw["ms1"]

    kern = dict(
        # channel-major weight layouts
        w3=raw["w3_hwio"].reshape(9 * Cin, Cout).T,   # (Cout, 9*Cin), k=(dy,dx,cin)
        scale3=scale3.reshape(Cout, 1),
        bias3=bias3.reshape(Cout, 1),
        ws1=raw["ws1"].T,                             # (C4, Cout)
        ssc=ssc.reshape(C4, 1),
        sbi=sbi.reshape(C4, 1),
        ws2=raw["ws2"],                               # (C4, 1)
        bs2=raw["bs2"].reshape(1, 1),
        wc1=raw["wc1"],                               # (Cout, C16)
        bc1=raw["bc1"].reshape(1, C16),
        wc2=raw["wc2"].T,                             # (Cout, C16)
        bc2=raw["bc2"].reshape(Cout, 1),
    )
    return raw, kern


# ----------------------------------------------------------------------------
if __name__ == "__main__":
    N, Cin, Cout, H, W = 2, 32, 32, 16, 16

    key = jax.random.PRNGKey(0)
    k_x, k_p = jax.random.split(key)
    x = jax.random.normal(k_x, (N, Cin, H, W), jnp.float32)
    raw, kern = make_params(k_p, Cin, Cout)

    out = jax.jit(dualatt_conblock)(x, kern)
    out = jax.block_until_ready(out)

    ref = jax.block_until_ready(ref_forward(x, raw))
    assert out.shape == (N, Cout, H, W)
    assert jnp.allclose(out, ref, atol=5e-4, rtol=5e-4), (
        float(jnp.max(jnp.abs(out - ref))))

    print("KERNEL_OK")
</pallas_src>

<mosaic_0001>
module attributes {stable_mosaic.version = 11 : i64} {
  func.func @_dualatt_kernel(%arg0: i32, %arg1: memref<1x288x256xf32, #tpu.memory_space<vmem>>, %arg2: memref<32x288xf32, #tpu.memory_space<vmem>>, %arg3: memref<32x1xf32, #tpu.memory_space<vmem>>, %arg4: memref<32x1xf32, #tpu.memory_space<vmem>>, %arg5: memref<8x32xf32, #tpu.memory_space<vmem>>, %arg6: memref<8x1xf32, #tpu.memory_space<vmem>>, %arg7: memref<8x1xf32, #tpu.memory_space<vmem>>, %arg8: memref<8x1xf32, #tpu.memory_space<vmem>>, %arg9: memref<1x1xf32, #tpu.memory_space<vmem>>, %arg10: memref<32x2xf32, #tpu.memory_space<vmem>>, %arg11: memref<1x2xf32, #tpu.memory_space<vmem>>, %arg12: memref<32x2xf32, #tpu.memory_space<vmem>>, %arg13: memref<32x1xf32, #tpu.memory_space<vmem>>, %arg14: memref<1x32x256xf32, #tpu.memory_space<vmem>>) attributes {dimension_semantics = [#tpu.dimension_semantics<parallel>], iteration_bounds = array<i64: 2>, scalar_prefetch = 0 : i64, scratch_operands = 0 : i64, tpu.core_type = #tpu.core_type<tc>, window_params = [{transform_indices = @transform_0, window_bounds = array<i64: 1, 288, 256>}, {pipeline_mode = #tpu.pipeline_mode<synchronous>, transform_indices = @transform_1, window_bounds = array<i64: 32, 288>}, {pipeline_mode = #tpu.pipeline_mode<synchronous>, transform_indices = @transform_2, window_bounds = array<i64: 32, 1>}, {pipeline_mode = #tpu.pipeline_mode<synchronous>, transform_indices = @transform_3, window_bounds = array<i64: 32, 1>}, {pipeline_mode = #tpu.pipeline_mode<synchronous>, transform_indices = @transform_4, window_bounds = array<i64: 8, 32>}, {pipeline_mode = #tpu.pipeline_mode<synchronous>, transform_indices = @transform_5, window_bounds = array<i64: 8, 1>}, {pipeline_mode = #tpu.pipeline_mode<synchronous>, transform_indices = @transform_6, window_bounds = array<i64: 8, 1>}, {pipeline_mode = #tpu.pipeline_mode<synchronous>, transform_indices = @transform_7, window_bounds = array<i64: 8, 1>}, {pipeline_mode = #tpu.pipeline_mode<synchronous>, transform_indices = @transform_8, window_bounds = array<i64: 1, 1>}, {pipeline_mode = #tpu.pipeline_mode<synchronous>, transform_indices = @transform_9, window_bounds = array<i64: 32, 2>}, {pipeline_mode = #tpu.pipeline_mode<synchronous>, transform_indices = @transform_10, window_bounds = array<i64: 1, 2>}, {pipeline_mode = #tpu.pipeline_mode<synchronous>, transform_indices = @transform_11, window_bounds = array<i64: 32, 2>}, {pipeline_mode = #tpu.pipeline_mode<synchronous>, transform_indices = @transform_12, window_bounds = array<i64: 32, 1>}, {transform_indices = @transform_13, window_bounds = array<i64: 1, 32, 256>}]} {
    %c0 = arith.constant 0 : index
    %c0_0 = arith.constant 0 : index
    %c0_1 = arith.constant 0 : index
    %0 = vector.load %arg1[%c0, %c0_0, %c0_1] : memref<1x288x256xf32, #tpu.memory_space<vmem>>, vector<1x288x256xf32>
    %1 = vector.shape_cast %0 : vector<1x288x256xf32> to vector<288x256xf32>
    %c0_2 = arith.constant 0 : index
    %c0_3 = arith.constant 0 : index
    %2 = vector.load %arg2[%c0_2, %c0_3] : memref<32x288xf32, #tpu.memory_space<vmem>>, vector<32x288xf32>
    %cst = arith.constant dense<0.000000e+00> : vector<32x256xf32>
    %3 = tpu.matmul %2, %1, %cst {dimension_numbers = #tpu.dot_dimension_numbers<[1], [0], [0], [1], [0, 0, 1, 1], [], []>} : vector<32x288xf32>, vector<288x256xf32>, vector<32x256xf32> -> vector<32x256xf32>
    %c0_4 = arith.constant 0 : index
    %c0_5 = arith.constant 0 : index
    %4 = vector.load %arg3[%c0_4, %c0_5] : memref<32x1xf32, #tpu.memory_space<vmem>>, vector<32x1xf32>
    %5 = vector.broadcast %4 : vector<32x1xf32> to vector<32x256xf32>
    %6 = arith.mulf %3, %5 : vector<32x256xf32>
    %c0_6 = arith.constant 0 : index
    %c0_7 = arith.constant 0 : index
    %7 = vector.load %arg4[%c0_6, %c0_7] : memref<32x1xf32, #tpu.memory_space<vmem>>, vector<32x1xf32>
    %8 = vector.broadcast %7 : vector<32x1xf32> to vector<32x256xf32>
    %9 = arith.addf %6, %8 : vector<32x256xf32>
    %cst_8 = arith.constant 0.000000e+00 : f32
    %10 = vector.broadcast %cst_8 : f32 to vector<32x256xf32>
    %11 = arith.maximumf %9, %10 : vector<32x256xf32>
    %c0_9 = arith.constant 0 : index
    %c0_10 = arith.constant 0 : index
    %12 = vector.load %arg5[%c0_9, %c0_10] : memref<8x32xf32, #tpu.memory_space<vmem>>, vector<8x32xf32>
    %cst_11 = arith.constant dense<0.000000e+00> : vector<8x256xf32>
    %13 = tpu.matmul %12, %11, %cst_11 {dimension_numbers = #tpu.dot_dimension_numbers<[1], [0], [0], [1], [0, 0, 1, 1], [], []>} : vector<8x32xf32>, vector<32x256xf32>, vector<8x256xf32> -> vector<8x256xf32>
    %c0_12 = arith.constant 0 : index
    %c0_13 = arith.constant 0 : index
    %14 = vector.load %arg6[%c0_12, %c0_13] : memref<8x1xf32, #tpu.memory_space<vmem>>, vector<8x1xf32>
    %15 = vector.broadcast %14 : vector<8x1xf32> to vector<8x256xf32>
    %16 = arith.mulf %13, %15 : vector<8x256xf32>
    %c0_14 = arith.constant 0 : index
    %c0_15 = arith.constant 0 : index
    %17 = vector.load %arg7[%c0_14, %c0_15] : memref<8x1xf32, #tpu.memory_space<vmem>>, vector<8x1xf32>
    %18 = vector.broadcast %17 : vector<8x1xf32> to vector<8x256xf32>
    %19 = arith.addf %16, %18 : vector<8x256xf32>
    %cst_16 = arith.constant 0.000000e+00 : f32
    %20 = vector.broadcast %cst_16 : f32 to vector<8x256xf32>
    %21 = arith.maximumf %19, %20 : vector<8x256xf32>
    %c0_17 = arith.constant 0 : index
    %c0_18 = arith.constant 0 : index
    %22 = vector.load %arg8[%c0_17, %c0_18] : memref<8x1xf32, #tpu.memory_space<vmem>>, vector<8x1xf32>
    %23 = vector.broadcast %22 : vector<8x1xf32> to vector<8x256xf32>
    %24 = arith.mulf %21, %23 : vector<8x256xf32>
    %cst_19 = arith.constant dense<0.000000e+00> : vector<256xf32>
    %25 = vector.multi_reduction <add>, %24, %cst_19 [0] : vector<8x256xf32> to vector<256xf32>
    %26 = vector.shape_cast %25 : vector<256xf32> to vector<1x256xf32>
    %c0_20 = arith.constant 0 : index
    %c0_21 = arith.constant 0 : index
    %27 = vector.load %arg9[%c0_20, %c0_21] : memref<1x1xf32, #tpu.memory_space<vmem>>, vector<1x1xf32>
    %28 = vector.broadcast %27 : vector<1x1xf32> to vector<1x256xf32>
    %29 = arith.addf %26, %28 : vector<1x256xf32>
    %30 = arith.negf %29 : vector<1x256xf32>
    %31 = math.exp %30 : vector<1x256xf32>
    %cst_22 = arith.constant 1.000000e+00 : f32
    %32 = vector.broadcast %cst_22 : f32 to vector<1x256xf32>
    %33 = arith.addf %32, %31 : vector<1x256xf32>
    %34 = arith.divf %32, %33 : vector<1x256xf32>
    %cst_23 = arith.constant dense<0.000000e+00> : vector<32xf32>
    %35 = vector.multi_reduction <add>, %11, %cst_23 [1] : vector<32x256xf32> to vector<32xf32>
    %36 = vector.shape_cast %35 : vector<32xf32> to vector<32x1xf32>
    %cst_24 = arith.constant 2.560000e+02 : f32
    %37 = vector.broadcast %cst_24 : f32 to vector<32x1xf32>
    %38 = arith.divf %36, %37 : vector<32x1xf32>
    %c0_25 = arith.constant 0 : index
    %c0_26 = arith.constant 0 : index
    %39 = vector.load %arg10[%c0_25, %c0_26] : memref<32x2xf32, #tpu.memory_space<vmem>>, vector<32x2xf32>
    %40 = vector.broadcast %38 : vector<32x1xf32> to vector<32x2xf32>
    %41 = arith.mulf %40, %39 : vector<32x2xf32>
    %cst_27 = arith.constant dense<0.000000e+00> : vector<2xf32>
    %42 = vector.multi_reduction <add>, %41, %cst_27 [0] : vector<32x2xf32> to vector<2xf32>
    %43 = vector.shape_cast %42 : vector<2xf32> to vector<1x2xf32>
    %c0_28 = arith.constant 0 : index
    %c0_29 = arith.constant 0 : index
    %44 = vector.load %arg11[%c0_28, %c0_29] : memref<1x2xf32, #tpu.memory_space<vmem>>, vector<1x2xf32>
    %45 = arith.addf %43, %44 : vector<1x2xf32>
    %cst_30 = arith.constant 0.000000e+00 : f32
    %46 = vector.broadcast %cst_30 : f32 to vector<1x2xf32>
    %47 = arith.maximumf %45, %46 : vector<1x2xf32>
    %c0_31 = arith.constant 0 : index
    %c0_32 = arith.constant 0 : index
    %48 = vector.load %arg12[%c0_31, %c0_32] : memref<32x2xf32, #tpu.memory_space<vmem>>, vector<32x2xf32>
    %49 = vector.broadcast %47 : vector<1x2xf32> to vector<32x2xf32>
    %50 = arith.mulf %49, %48 : vector<32x2xf32>
    %cst_33 = arith.constant dense<0.000000e+00> : vector<32xf32>
    %51 = vector.multi_reduction <add>, %50, %cst_33 [1] : vector<32x2xf32> to vector<32xf32>
    %52 = vector.shape_cast %51 : vector<32xf32> to vector<32x1xf32>
    %c0_34 = arith.constant 0 : index
    %c0_35 = arith.constant 0 : index
    %53 = vector.load %arg13[%c0_34, %c0_35] : memref<32x1xf32, #tpu.memory_space<vmem>>, vector<32x1xf32>
    %54 = arith.addf %52, %53 : vector<32x1xf32>
    %55 = arith.negf %54 : vector<32x1xf32>
    %56 = math.exp %55 : vector<32x1xf32>
    %cst_36 = arith.constant 1.000000e+00 : f32
    %57 = vector.broadcast %cst_36 : f32 to vector<32x1xf32>
    %58 = arith.addf %57, %56 : vector<32x1xf32>
    %59 = arith.divf %57, %58 : vector<32x1xf32>
    %cst_37 = arith.constant 1.000000e+00 : f32
    %60 = vector.broadcast %cst_37 : f32 to vector<1x256xf32>
    %61 = arith.addf %34, %60 : vector<1x256xf32>
    %62 = vector.broadcast %59 : vector<32x1xf32> to vector<32x256xf32>
    %63 = arith.mulf %11, %62 : vector<32x256xf32>
    %64 = vector.broadcast %61 : vector<1x256xf32> to vector<32x256xf32>
    %65 = arith.mulf %64, %63 : vector<32x256xf32>
    %c0_38 = arith.constant 0 : index
    %c0_39 = arith.constant 0 : index
    %c0_40 = arith.constant 0 : index
    %66 = vector.load %arg14[%c0_38, %c0_39, %c0_40] : memref<1x32x256xf32, #tpu.memory_space<vmem>>, vector<1x32x256xf32>
    %67 = vector.shape_cast %66 : vector<1x32x256xf32> to vector<32x256xf32>
    %68 = vector.shape_cast %65 : vector<32x256xf32> to vector<1x32x256xf32>
    tpu.vector_store %arg14[%c0_38, %c0_39, %c0_40], %68 {strides = array<i32>} : memref<1x32x256xf32, #tpu.memory_space<vmem>>, vector<1x32x256xf32>,
    return
  }
  func.func @transform_0(%arg0: i32) -> (i32, i32, i32) {
    %c0_i32 = arith.constant 0 : i32
    %c0_i32_0 = arith.constant 0 : i32
    %c0_i32_1 = arith.constant 0 : i32
    return %arg0, %c0_i32, %c0_i32_0 : i32, i32, i32
  }
  func.func @transform_1(%arg0: i32) -> (i32, i32) {
    %c0_i32 = arith.constant 0 : i32
    %c0_i32_0 = arith.constant 0 : i32
    %c0_i32_1 = arith.constant 0 : i32
    return %c0_i32, %c0_i32_0 : i32, i32
  }
  func.func @transform_2(%arg0: i32) -> (i32, i32) {
    %c0_i32 = arith.constant 0 : i32
    %c0_i32_0 = arith.constant 0 : i32
    %c0_i32_1 = arith.constant 0 : i32
    return %c0_i32, %c0_i32_0 : i32, i32
  }
  func.func @transform_3(%arg0: i32) -> (i32, i32) {
    %c0_i32 = arith.constant 0 : i32
    %c0_i32_0 = arith.constant 0 : i32
    %c0_i32_1 = arith.constant 0 : i32
    return %c0_i32, %c0_i32_0 : i32, i32
  }
  func.func @transform_4(%arg0: i32) -> (i32, i32) {
    %c0_i32 = arith.constant 0 : i32
    %c0_i32_0 = arith.constant 0 : i32
    %c0_i32_1 = arith.constant 0 : i32
    return %c0_i32, %c0_i32_0 : i32, i32
  }
  func.func @transform_5(%arg0: i32) -> (i32, i32) {
    %c0_i32 = arith.constant 0 : i32
    %c0_i32_0 = arith.constant 0 : i32
    %c0_i32_1 = arith.constant 0 : i32
    return %c0_i32, %c0_i32_0 : i32, i32
  }
  func.func @transform_6(%arg0: i32) -> (i32, i32) {
    %c0_i32 = arith.constant 0 : i32
    %c0_i32_0 = arith.constant 0 : i32
    %c0_i32_1 = arith.constant 0 : i32
    return %c0_i32, %c0_i32_0 : i32, i32
  }
  func.func @transform_7(%arg0: i32) -> (i32, i32) {
    %c0_i32 = arith.constant 0 : i32
    %c0_i32_0 = arith.constant 0 : i32
    %c0_i32_1 = arith.constant 0 : i32
    return %c0_i32, %c0_i32_0 : i32, i32
  }
  func.func @transform_8(%arg0: i32) -> (i32, i32) {
    %c0_i32 = arith.constant 0 : i32
    %c0_i32_0 = arith.constant 0 : i32
    %c0_i32_1 = arith.constant 0 : i32
    return %c0_i32, %c0_i32_0 : i32, i32
  }
  func.func @transform_9(%arg0: i32) -> (i32, i32) {
    %c0_i32 = arith.constant 0 : i32
    %c0_i32_0 = arith.constant 0 : i32
    %c0_i32_1 = arith.constant 0 : i32
    return %c0_i32, %c0_i32_0 : i32, i32
  }
  func.func @transform_10(%arg0: i32) -> (i32, i32) {
    %c0_i32 = arith.constant 0 : i32
    %c0_i32_0 = arith.constant 0 : i32
    %c0_i32_1 = arith.constant 0 : i32
    return %c0_i32, %c0_i32_0 : i32, i32
  }
  func.func @transform_11(%arg0: i32) -> (i32, i32) {
    %c0_i32 = arith.constant 0 : i32
    %c0_i32_0 = arith.constant 0 : i32
    %c0_i32_1 = arith.constant 0 : i32
    return %c0_i32, %c0_i32_0 : i32, i32
  }
  func.func @transform_12(%arg0: i32) -> (i32, i32) {
    %c0_i32 = arith.constant 0 : i32
    %c0_i32_0 = arith.constant 0 : i32
    %c0_i32_1 = arith.constant 0 : i32
    return %c0_i32, %c0_i32_0 : i32, i32
  }
  func.func @transform_13(%arg0: i32) -> (i32, i32, i32) {
    %c0_i32 = arith.constant 0 : i32
    %c0_i32_0 = arith.constant 0 : i32
    %c0_i32_1 = arith.constant 0 : i32
    return %arg0, %c0_i32, %c0_i32_0 : i32, i32, i32
  }
}

</mosaic_0001>

<bundles_post_ra>
// kernel: dualatt_conblock.1
= control target key start
LH: loop header
LB: loop body
LE: loop exit
PB: predicated region body
PF: predicated region fallthrough
CT: control target
= control target key end

     0   :  { %s1327_s27 = smov 0   ;;  %s1624_s0 = inlined_call_operand.vmem [shape: f32[2,288,256], index: 0, kind: input, shape index: {}]   ;;  %s1625_s1 = inlined_call_operand.vmem [shape: f32[32,288], index: 1, kind: input, shape index: {}]   ;;  %s1626_s2 = inlined_call_operand.vmem [shape: f32[32,1], index: 2, kind: input, shape index: {}]   ;;  %s1627_s3 = inlined_call_operand.vmem [shape: f32[32,1], index: 3, kind: input, shape index: {}]   ;;  %s1628_s4 = inlined_call_operand.vmem [shape: f32[8,32], index: 4, kind: input, shape index: {}]   ;;  %s1629_s5 = inlined_call_operand.vmem [shape: f32[8,1], index: 5, kind: input, shape index: {}]   ;;  %s1630_s6 = inlined_call_operand.vmem [shape: f32[8,1], index: 6, kind: input, shape index: {}]   ;;  %s1631_s7 = inlined_call_operand.vmem [shape: f32[8,1], index: 7, kind: input, shape index: {}]   ;;  %s1632_s8 = inlined_call_operand.<no memory space> [shape: f32[1,1], index: 8, kind: input, shape index: {}]   ;;  %s1633_s9 = inlined_call_operand.vmem [shape: f32[32,2], index: 9, kind: input, shape index: {}]   ;;  %s1634_s10 = inlined_call_operand.vmem [shape: f32[1,2], index: 10, kind: input, shape index: {}]   ;;  %s1635_s11 = inlined_call_operand.vmem [shape: f32[32,2], index: 11, kind: input, shape index: {}]   ;;  %s1636_s12 = inlined_call_operand.vmem [shape: f32[32,1], index: 12, kind: input, shape index: {}]   ;;  %s1637_s13 = inlined_call_operand.vmem [shape: f32[2,32,256], index: 13, kind: output, shape index: {}]  }
   0x1   :  { %v18_v0 = vstv %s1632_s8 }
   0x2   :  { %19 = vst [vmem:[#allocation2] sm:$0x1] %v18_v0 }
   0x3 LB: > { %s1169_s28 = sadd.s32 4294967295, %s1250_s27   ;;  %p1173_p0 = scmp.ge.s32.totalorder %s1250_s27, 1  ;;  %s1250_s27 = sphi %s1327_s27, %s25_s27  }
   0x4   : > { %p389_p1 = scmp.lt.s32.totalorder %s1250_s27, 3 }
   0x6   : > { %p390_p2 = pnand %p1173_p0, %p389_p1 }
   0x7   : > { %p433_p3 = scmp.lt.s32.totalorder (!%p390_p2), %s1169_s28, 1 }
   0x8   : > { %393 = sbr.rel (%p390_p2) target bundleno = 657 (0x291), region = 72 }
   0xd   : > { %s1639_s28 = smov (!%p433_p3, %s1169_s28), 1  ;;  %v1252_v9 = vmov 0   ;;  %v1361_v15 = vld [vmem:[%s1625_s1 + $0x10] sm:$0xff]  ;;  %vm527_vm0 = vcmask 261120   ;;  %v1384_v32 = vld [vmem:[%s1625_s1 + $0x28] sm:$0xff]  ;;  %v1406_v48 = vld [vmem:[%s1625_s1 + $0x40] sm:$0xff] }
   0xe   : > { %s1204_s8 = smul.u32 576, %s1639_s28  ;;  %1216 = vset.pattern.permute.xlu1 %v1252_v9  ;;  %1215 = vset.pattern.permute.xlu0 %v1252_v9  ;;  %vm946_vm2 = vcmask 15360   ;;  %s1195_s26 = sshll.u32 %s1639_s28, 6 }
   0xf   : > { %1217 = vset.pattern.permute.xlu2 %v1252_v9  ;;  %v714_v9 = vld [vmem:[%s1626_s2] sm:$0xff]  ;;  %s442_s30 = scalar_lea.vmem %s1637_s13, %s1195_s26 }
  0x10   : > { %s1341_s14 = scalar_lea.vmem %s1624_s0, %s1204_s8 }
  0x11   : > { %v473_v1 = vld [vmem:[%s1341_s14 + $0xf0] sm:$0xff]  ;;  %v471_v4 = vld [vmem:[%s1341_s14 + $0xe0] sm:$0xff]  ;;  %v474_v14 = vld [vmem:[%s1341_s14 + $0xf8] sm:$0xff] }
  0x12   : > { %v505_v2 = vld [vmem:[%s1341_s14 + $0x1f0] sm:$0xff]  ;;  %540 = vmatpush.msra.mxu0 %v473_v1  ;;  %v503_v5 = vld [vmem:[%s1341_s14 + $0x1e0] sm:$0xff]  ;;  %627 = vmatpush.msra.mxu3 %v474_v14  ;;  %v472_v17 = vld [vmem:[%s1341_s14 + $0xe8] sm:$0xff] }
  0x13   : > { %v513_v3 = vld [vmem:[%s1341_s14 + $0x230] sm:$0xff]  ;;  %569 = vmatpush.msra.mxu1 %v505_v2  ;;  %v511_v6 = vld [vmem:[%s1341_s14 + $0x220] sm:$0xff]  ;;  %v506_v18 = vld [vmem:[%s1341_s14 + $0x1f8] sm:$0xff] }
  0x14   : > { %610 = vmatpush.msra.mxu2 %v513_v3  ;;  %v469_v7 = vld [vmem:[%s1341_s14 + $0xd0] sm:$0xff]  ;;  %541 = vmatpush.msra.mxu0 %v471_v4  ;;  %v467_v11 = vld [vmem:[%s1341_s14 + $0xc0] sm:$0xff]  ;;  %v470_v21 = vld [vmem:[%s1341_s14 + $0xd8] sm:$0xff] }
  0x15   : > { %v501_v8 = vld [vmem:[%s1341_s14 + $0x1d0] sm:$0xff]  ;;  %570 = vmatpush.msra.mxu1 %v503_v5  ;;  %v499_v12 = vld [vmem:[%s1341_s14 + $0x1c0] sm:$0xff]  ;;  %628 = vmatpush.msra.mxu3 %v472_v17  ;;  %v504_v22 = vld [vmem:[%s1341_s14 + $0x1e8] sm:$0xff] }
  0x16   : > { %v509_v10 = vld [vmem:[%s1341_s14 + $0x210] sm:$0xff]  ;;  %611 = vmatpush.msra.mxu2 %v511_v6  ;;  %542 = vmatpush.msra.mxu0 %v469_v7  ;;  %v507_v13 = vld [vmem:[%s1341_s14 + $0x200] sm:$0xff]  ;;  %v468_v25 = vld [vmem:[%s1341_s14 + $0xc8] sm:$0xff] }
  0x17   : > { %571 = vmatpush.msra.mxu1 %v501_v8  ;;  %v465_v16 = vld [vmem:[%s1341_s14 + $0xb0] sm:$0xff]  ;;  %v463_v20 = vld [vmem:[%s1341_s14 + $0xa0] sm:$0xff]  ;;  %v502_v26 = vld [vmem:[%s1341_s14 + $0x1d8] sm:$0xff]  ;;  %629 = vmatpush.msra.mxu3 %v470_v21 }
  0x18   : > { %612 = vmatpush.msra.mxu2 %v509_v10  ;;  %543 = vmatpush.msra.mxu0 %v467_v11  ;;  %v497_v19 = vld [vmem:[%s1341_s14 + $0x1b0] sm:$0xff]  ;;  %v495_v23 = vld [vmem:[%s1341_s14 + $0x1a0] sm:$0xff]  ;;  %v466_v29 = vld [vmem:[%s1341_s14 + $0xb8] sm:$0xff] }
  0x19   : > { %572 = vmatpush.msra.mxu1 %v499_v12  ;;  %v461_v24 = vld [vmem:[%s1341_s14 + $0x90] sm:$0xff]  ;;  %v459_v28 = vld [vmem:[%s1341_s14 + $0x80] sm:$0xff]  ;;  %v500_v30 = vld [vmem:[%s1341_s14 + $0x1c8] sm:$0xff]  ;;  %630 = vmatpush.msra.mxu3 %v468_v25 }
  0x1a   : > { %613 = vmatpush.msra.mxu2 %v507_v13  ;;  %544 = vmatpush.msra.mxu0 %v465_v16  ;;  %v493_v27 = vld [vmem:[%s1341_s14 + $0x190] sm:$0xff]  ;;  %v491_v31 = vld [vmem:[%s1341_s14 + $0x180] sm:$0xff]  ;;  %v498_v34 = vld [vmem:[%s1341_s14 + $0x1b8] sm:$0xff] }
  0x1b   : > { %1177 = vmatmul.msk.f32.vlgmr.msra.gmra.mxu2 %vm527_vm0, %v1361_v15  ;;  %573 = vmatpush.msra.mxu1 %v497_v19  ;;  %v457_v33 = vld [vmem:[%s1341_s14 + $0x70] sm:$0xff]  ;;  %v455_v36 = vld [vmem:[%s1341_s14 + $0x60] sm:$0xff]  ;;  %v464_v37 = vld [vmem:[%s1341_s14 + $0xa8] sm:$0xff] }
  0x1c   : > { %656 = vmatpush.msrb.mxu2 %v506_v18  ;;  %545 = vmatpush.msra.mxu0 %v463_v20  ;;  %v489_v35 = vld [vmem:[%s1341_s14 + $0x170] sm:$0xff]  ;;  %v496_v38 = vld [vmem:[%s1341_s14 + $0x1a8] sm:$0xff]  ;;  %v487_v39 = vld [vmem:[%s1341_s14 + $0x160] sm:$0xff] }
  0x1d   : > { %574 = vmatpush.msra.mxu1 %v495_v23  ;;  %631 = vmatpush.msra.mxu3 %v466_v29  ;;  %v453_v40 = vld [vmem:[%s1341_s14 + $0x50] sm:$0xff]  ;;  %v462_v41 = vld [vmem:[%s1341_s14 + $0x98] sm:$0xff]  ;;  %v451_v44 = vld [vmem:[%s1341_s14 + $0x40] sm:$0xff] }
  0x1e   : > { %657 = vmatpush.msrb.mxu2 %v504_v22  ;;  %546 = vmatpush.msra.mxu0 %v461_v24  ;;  %v494_v42 = vld [vmem:[%s1341_s14 + $0x198] sm:$0xff]  ;;  %v485_v43 = vld [vmem:[%s1341_s14 + $0x150] sm:$0xff]  ;;  %v460_v45 = vld [vmem:[%s1341_s14 + $0x88] sm:$0xff] }
  0x1f   : > { %575 = vmatpush.msra.mxu1 %v493_v27  ;;  %632 = vmatpush.msra.mxu3 %v464_v37  ;;  %v492_v46 = vld [vmem:[%s1341_s14 + $0x188] sm:$0xff]  ;;  %v483_v47 = vld [vmem:[%s1341_s14 + $0x140] sm:$0xff]  ;;  %v449_v49 = vld [vmem:[%s1341_s14 + $0x30] sm:$0xff] }
  0x20   : > { %658 = vmatpush.msrb.mxu2 %v502_v26  ;;  %547 = vmatpush.msra.mxu0 %v459_v28  ;;  %v490_v50 = vld [vmem:[%s1341_s14 + $0x178] sm:$0xff]  ;;  %v481_v51 = vld [vmem:[%s1341_s14 + $0x130] sm:$0xff]  ;;  %v447_v53 = vld [vmem:[%s1341_s14 + $0x20] sm:$0xff] }
  0x21   : > { %576 = vmatpush.msra.mxu1 %v491_v31  ;;  %633 = vmatpush.msra.mxu3 %v462_v41  ;;  %v458_v52 = vld [vmem:[%s1341_s14 + $0x78] sm:$0xff]  ;;  %v488_v54 = vld [vmem:[%s1341_s14 + $0x168] sm:$0xff]  ;;  %v479_v55 = vld [vmem:[%s1341_s14 + $0x120] sm:$0xff] }
  0x22   : > { %659 = vmatpush.msrb.mxu2 %v500_v30  ;;  %548 = vmatpush.msra.mxu0 %v457_v33  ;;  %v456_v56 = vld [vmem:[%s1341_s14 + $0x68] sm:$0xff]  ;;  %v445_v57 = vld [vmem:[%s1341_s14 + $0x10] sm:$0xff]  ;;  %v486_v58 = vld [vmem:[%s1341_s14 + $0x158] sm:$0xff] }
  0x23   : > { %1178 = vmatmul.msk.f32.gmra.mxu2 %vm527_vm0, %v1384_v32  ;;  %577 = vmatpush.msra.mxu1 %v489_v35  ;;  %v477_v59 = vld [vmem:[%s1341_s14 + $0x110] sm:$0xff]  ;;  %v454_v60 = vld [vmem:[%s1341_s14 + $0x58] sm:$0xff]  ;;  %v443_v61 = vld [vmem:[%s1341_s14] sm:$0xff] }
  0x24   : > { %660 = vmatpush.msrb.mxu2 %v498_v34  ;;  %549 = vmatpush.msra.mxu0 %v455_v36  ;;  %v484_v62 = vld [vmem:[%s1341_s14 + $0x148] sm:$0xff]  ;;  %v475_v63 = vld [vmem:[%s1341_s14 + $0x100] sm:$0xff]  ;;  %v1435_v3 = vld [vmem:[%s1625_s1 + $0x58] sm:$0xff] }
  0x25   : > { %578 = vmatpush.msra.mxu1 %v487_v39  ;;  %634 = vmatpush.msra.mxu3 %v460_v45  ;;  %v452_v0 = vld [vmem:[%s1341_s14 + $0x48] sm:$0xff]  ;;  %v515_v1 = vld [vmem:[%s1625_s1] sm:$0xff]  ;;  %v482_v4 = vld [vmem:[%s1341_s14 + $0x138] sm:$0xff] }
  0x26   : > { %661 = vmatpush.msrb.mxu2 %v496_v38  ;;  %550 = vmatpush.msra.mxu0 %v453_v40  ;;  %v516_v2 = vld [vmem:[%s1625_s1 + $0x8] sm:$0xff]  ;;  %v749_v5 = vld [vmem:[%s1627_s3 + $0x18] sm:$0xff]  ;;  %v519_v20 = vld [vmem:[%s1625_s1 + $0x20] sm:$0xff] }
  0x27   : > { %579 = vmatpush.msra.mxu1 %v485_v43  ;;  %635 = vmatpush.msra.mxu3 %v458_v52  ;;  %v450_v6 = vld [vmem:[%s1341_s14 + $0x38] sm:$0xff]  ;;  %v480_v8 = vld [vmem:[%s1341_s14 + $0x128] sm:$0xff]  ;;  %v716_v22 = vld [vmem:[%s1626_s2 + $0x10] sm:$0xff] }
  0x28   : > { %662 = vmatpush.msrb.mxu2 %v494_v42  ;;  %551 = vmatpush.msra.mxu0 %v451_v44  ;;  %v514_v7 = vld [vmem:[%s1341_s14 + $0x238] sm:$0xff]  ;;  %v448_v11 = vld [vmem:[%s1341_s14 + $0x28] sm:$0xff]  ;;  %v748_v24 = vld [vmem:[%s1627_s3 + $0x10] sm:$0xff] }
  0x29   : > { %580 = vmatpush.msra.mxu1 %v483_v47  ;;  %636 = vmatpush.msra.mxu3 %v456_v56  ;;  %v717_v10 = vld [vmem:[%s1626_s2 + $0x18] sm:$0xff]  ;;  %v512_v12 = vld [vmem:[%s1341_s14 + $0x228] sm:$0xff]  ;;  %v521_v25 = vld [vmem:[%s1625_s1 + $0x30] sm:$0xff] }
  0x2a   : > { %663 = vmatpush.msrb.mxu2 %v492_v46  ;;  %552 = vmatpush.msra.mxu0 %v449_v49  ;;  %v478_v13 = vld [vmem:[%s1341_s14 + $0x118] sm:$0xff]  ;;  %v476_v17 = vld [vmem:[%s1341_s14 + $0x108] sm:$0xff]  ;;  %v746_v27 = vld [vmem:[%s1627_s3] sm:$0xff] }
  0x2b   : > { %1179 = vmatmul.msk.f32.gmra.mxu2 %vm527_vm0, %v1406_v48  ;;  %581 = vmatpush.msra.mxu1 %v481_v51  ;;  %v446_v14 = vld [vmem:[%s1341_s14 + $0x18] sm:$0xff]  ;;  %v444_v19 = vld [vmem:[%s1341_s14 + $0x8] sm:$0xff]  ;;  %v525_v30 = vld [vmem:[%s1625_s1 + $0x50] sm:$0xff] }
  0x2c   : > { %664 = vmatpush.msrb.mxu2 %v490_v50  ;;  %553 = vmatpush.msra.mxu0 %v447_v53  ;;  %v510_v16 = vld [vmem:[%s1341_s14 + $0x218] sm:$0xff]  ;;  %v715_v21 = vld [vmem:[%s1626_s2 + $0x8] sm:$0xff] }
  0x2d   : > { %582 = vmatpush.msra.mxu1 %v479_v55  ;;  %637 = vmatpush.msra.mxu3 %v454_v60  ;;  %v518_v18 = vld [vmem:[%s1625_s1 + $0x18] sm:$0xff]  ;;  %v508_v23 = vld [vmem:[%s1341_s14 + $0x208] sm:$0xff] }
  0x2e   : > { %665 = vmatpush.msrb.mxu2 %v488_v54  ;;  %554 = vmatpush.msra.mxu0 %v445_v57  ;;  %v522_v26 = vld [vmem:[%s1625_s1 + $0x38] sm:$0xff]  ;;  %v747_v28 = vld [vmem:[%s1627_s3 + $0x8] sm:$0xff] }
  0x2f   : > { %583 = vmatpush.msra.mxu1 %v477_v59  ;;  %638 = vmatpush.msra.mxu3 %v452_v0  ;;  %v524_v29 = vld [vmem:[%s1625_s1 + $0x48] sm:$0xff] }
  0x30   : > { %666 = vmatpush.msrb.mxu2 %v486_v58  ;;  %555 = vmatpush.msra.mxu0 %v443_v61 }
  0x31   : > { %584 = vmatpush.msra.mxu1 %v475_v63  ;;  %556 = vmatmul.f32.vlgmr.msra.gmra.mxu0 %v515_v1 }
  0x32   : > { %667 = vmatpush.msrb.mxu2 %v484_v62  ;;  %585 = vmatmul.f32.vlgmr.msra.gmra.mxu1 %v516_v2 }
  0x33   : > { %1180 = vmatmul.msk.f32.gmra.mxu2 %vm527_vm0, %v1435_v3  ;;  %767 = vperm.xlu1 %1216, %v749_v5  }
  0x34   : > { %668 = vmatpush.msrb.mxu2 %v482_v4  ;;  %639 = vmatpush.msra.mxu3 %v450_v6 }
  0x35   : > { %697 = vmatpush.msrb.mxu0 %v514_v7  ;;  %735 = vperm.xlu0 %1215, %v717_v10  }
  0x36   : > { %669 = vmatpush.msrb.mxu2 %v480_v8  ;;  %640 = vmatpush.msra.mxu3 %v448_v11 }
  0x37   : > { %698 = vmatpush.msrb.mxu0 %v512_v12  ;;  %1196 = vmatpush.msrb.mxu1 %v514_v7 }
  0x38   : > { %670 = vmatpush.msrb.mxu2 %v478_v13  ;;  %641 = vmatpush.msra.mxu3 %v446_v14 }
  0x39   : > { %699 = vmatpush.msrb.mxu0 %v510_v16  ;;  %1198 = vmatpush.msrb.mxu1 %v512_v12 }
  0x3a   : > { %671 = vmatpush.msrb.mxu2 %v476_v17  ;;  %559 = vmatmul.f32.gmra.mxu0 %v518_v18 }
  0x3b   : > { %642 = vmatpush.msra.mxu3 %v444_v19  ;;  %588 = vmatmul.f32.gmra.mxu1 %v519_v20 }
  0x3c   : > { %643 = vmatmul.f32.vlgmr.msra.gmra.mxu3 %v515_v1  ;;  %672 = vmatmul.f32.vlgmr.msrb.gmra.mxu2 %v516_v2 }
  0x3d   : > { %1197 = vmatpush.msra.mxu2 %v514_v7  ;;  %725 = vperm.xlu1 %1216, %v715_v21  }
  0x3e   : > { %730 = vperm.xlu0 %1215, %v716_v22   ;;  %700 = vmatpush.msrb.mxu0 %v508_v23 }
  0x3f   : > { %1199 = vmatpush.msra.mxu2 %v512_v12  ;;  %1200 = vmatpush.msrb.mxu1 %v510_v16 }
  0x40   : > { %762 = vperm.xlu2 %1217, %v748_v24  }
  0x41   : > { %1201 = vmatpush.msra.mxu2 %v510_v16  ;;  %1202 = vmatpush.msrb.mxu1 %v508_v23 }
  0x42   : > { %562 = vmatmul.f32.gmra.mxu0 %v521_v25 }
  0x43   : > { %591 = vmatmul.f32.gmra.mxu1 %v522_v26  ;;  %1203 = vmatpush.msra.mxu2 %v508_v23 }
  0x44   : > { %646 = vmatmul.f32.gmra.mxu3 %v518_v18  ;;  %675 = vmatmul.f32.gmra.mxu2 %v519_v20 }
  0x45   : > { %752 = vperm.xlu1 %1216, %v746_v27   ;;  %v786_v27 = vld [vmem:[%s1628_s4] sm:$0xff] }
  0x46   : > { %757 = vperm.xlu0 %1215, %v747_v28  }
  0x48   : > { %720 = vperm.xlu2 %1217, %v714_v9  }
  0x4a   : > { %565 = vmatmul.f32.gmra.mxu0 %v524_v29 }
  0x4b   : > { %594 = vmatmul.f32.gmra.mxu1 %v525_v30 }
  0x4c   : > { %649 = vmatmul.f32.gmra.mxu3 %v521_v25  ;;  %678 = vmatmul.f32.gmra.mxu2 %v522_v26 }
  0x52   : > { %1181 = vmatmul.msk.f32.vlgmr.msrb.gmra.mxu0 %vm527_vm0, %v1361_v15 }
  0x53   : > { %1183 = vmatmul.msk.f32.vlgmr.msrb.gmra.mxu1 %vm527_vm0, %v1406_v48 }
  0x54   : > { %652 = vmatmul.f32.gmra.mxu3 %v524_v29  ;;  %681 = vmatmul.f32.gmra.mxu2 %v525_v30 }
  0x5a   : > { %1182 = vmatmul.msk.f32.gmra.mxu0 %vm527_vm0, %v1384_v32 }
  0x5c   : > { %1184 = vmatmul.msk.f32.vlgmr.msra.gmra.mxu2 %vm527_vm0, %v1435_v3 }
  0x9a   : > { %v763_v32 = vpop.permute.xlu2 %762 }
  0x9e   : > { %v615_v31 = vpop.f32.mrf.mxu2 }
  0xa2   : > { %v721_v60 = vpop.permute.xlu2 %720 }
  0xa5   : > { %v1502_v15 = vpop.permute.xlu1 %767 }
  0xa6   : > { %v618_v33 = vpop.f32.mrf.mxu2 }
  0xa7   : > { %v1504_v40 = vpop.permute.xlu0 %735 }
  0xae   : > { %v621_v34 = vpop.f32.mrf.mxu2  ;;  %v557_v35 = vpop.f32.mrf.mxu0 }
  0xaf   : > { %v586_v36 = vpop.f32.mrf.mxu1  ;;  %v726_v46 = vpop.permute.xlu1 %725 }
  0xb0   : > { %v731_v47 = vpop.permute.xlu0 %730  ;;  %v587_v49 = vadd.f32 %v586_v36, %v557_v35 }
  0xb2   : > { %v616_v57 = vadd.f32 %v615_v31, %v587_v49 }
  0xb4   : > { %v738_v1 = vmul.f32 %v721_v60, %v616_v57 }
  0xb6   : > { %v624_v37 = vpop.f32.mrf.mxu2 }
  0xb7   : > { %v560_v38 = vpop.f32.mrf.mxu0  ;;  %v753_v63 = vpop.permute.xlu1 %752 }
  0xb8   : > { %v589_v39 = vpop.f32.mrf.mxu1  ;;  %v758_v0 = vpop.permute.xlu0 %757  ;;  %v770_v16 = vadd.f32 %v753_v63, %v738_v1 }
  0xb9   : > { %v590_v48 = vadd.f32 %v589_v39, %v560_v38 }
  0xba   : > { %v1516_v23 = vmax.f32 %v770_v16, 0.0 }
  0xbb   : > { %v619_v55 = vadd.f32 %v618_v33, %v590_v48 }
  0xbd   : > { %v740_v61 = vmul.f32 %v726_v46, %v619_v55  ;;  %v939_v55 = vld [vmem:[%s1633_s9 + $0x8] sm:$0xff] }
  0xbf   : > { %v644_v41 = vpop.f32.mrf.mxu3  ;;  %v673_v42 = vpop.f32.mrf.mxu2  ;;  %v772_v11 = vadd.f32 %v758_v0, %v740_v61 }
  0xc0   : > { %v563_v43 = vpop.f32.mrf.mxu0  ;;  %v592_v44 = vpop.f32.mrf.mxu1  ;;  %v674_v2 = vadd.f32 %v673_v42, %v644_v41 }
  0xc1   : > { %v593_v45 = vadd.f32 %v592_v44, %v563_v43  ;;  %v1513_v20 = vmax.f32 %v772_v11, 0.0 }
  0xc3   : > { %v622_v50 = vadd.f32 %v621_v34, %v593_v45 }
  0xc5   : > { %v742_v58 = vmul.f32 %v731_v47, %v622_v50 }
  0xc7   : > { %v647_v51 = vpop.f32.mrf.mxu3  ;;  %v676_v52 = vpop.f32.mrf.mxu2  ;;  %v774_v6 = vadd.f32 %v763_v32, %v742_v58 }
  0xc8   : > { %v566_v53 = vpop.f32.mrf.mxu0  ;;  %v595_v54 = vpop.f32.mrf.mxu1  ;;  %v677_v24 = vadd.f32 %v676_v52, %v647_v51 }
  0xc9   : > { %v596_v56 = vadd.f32 %v595_v54, %v566_v53  ;;  %v1511_v18 = vmax.f32 %v774_v6, 0.0  ;;  %v938_v54 = vld [vmem:[%s1633_s9] sm:$0xff] }
  0xcb   : > { %v625_v59 = vadd.f32 %v624_v37, %v596_v56 }
  0xcd   : > { %v744_v62 = vmul.f32 %v1504_v40, %v625_v59 }
  0xcf   : > { %v776_v3 = vadd.f32 %v1502_v15, %v744_v62  ;;  %v650_v4 = vpop.f32.mrf.mxu3  ;;  %v679_v5 = vpop.f32.mrf.mxu2 }
  0xd0   : > { %v680_v7 = vadd.f32 %v679_v5, %v650_v4  ;;  %v702_v8 = vpop.f32.mrf.mxu0  ;;  %v708_v10 = vpop.f32.mrf.mxu1 }
  0xd1   : > { %v1508_v12 = vmax.f32 %v776_v3, 0.0  ;;  %v703_v13 = vadd.f32 %v702_v8, %v674_v2  ;;  %v941_v2 = vld [vmem:[%s1633_s9 + $0x18] sm:$0xff] }
  0xd2   : > { %v709_v14 = vadd.f32 %v708_v10, %v680_v7 }
  0xd3   : > { %v739_v17 = vmul.f32 %v721_v60, %v703_v13  ;;  %802 = vmatpush.msra.mxu1 %v1508_v12  ;;  %v940_v60 = vld [vmem:[%s1633_s9 + $0x10] sm:$0xff] }
  0xd4   : > { %v743_v19 = vmul.f32 %v731_v47, %v709_v14 }
  0xd5   : > { %v771_v21 = vadd.f32 %v753_v63, %v739_v17  ;;  %803 = vmatpush.msra.mxu1 %v1511_v18 }
  0xd6   : > { %v775_v22 = vadd.f32 %v763_v32, %v743_v19  ;;  %v960_v19 = vld [vmem:[%s1634_s10] sm:$0x1] }
  0xd7   : > { %v1518_v25 = vmax.f32 %v771_v21, 0.0  ;;  %v682_v26 = vpop.f32.mrf.mxu2  ;;  %804 = vmatpush.msra.mxu1 %v1513_v20  ;;  %v653_v33 = vpop.f32.mrf.mxu3 }
  0xd8   : > { %v1524_v28 = vmax.f32 %v775_v22, 0.0  ;;  %v705_v9 = vpop.f32.mrf.mxu0  ;;  %v683_v36 = vadd.f32 %v682_v26, %v653_v33  ;;  %v965_v26 = vld [vmem:[%s1635_s11 + $0x10] sm:$0xff] }
  0xd9   : > { %v706_v29 = vadd.f32 %v705_v9, %v677_v24  ;;  %805 = vmatpush.msra.mxu1 %v1516_v23  ;;  %v915_v30 = vadd.f32 %v1518_v25, %v1516_v23  ;;  %v963_v9 = vld [vmem:[%s1635_s11] sm:$0xff] }
  0xda   : > { %v921_v31 = vadd.f32 %v1524_v28, %v1511_v18  ;;  %1185 = vmatmul.msk.f32.vlgmr.msra.gmra.mxu1 %vm527_vm0, %v786_v27 }
  0xdb   : > { %v741_v34 = vmul.f32 %v726_v46, %v706_v29  ;;  %916 = vadd.xlane.f32.xlu2 %v915_v30 }
  0xdc   : > { %922 = vadd.xlane.f32.xlu1 %v921_v31 }
  0xdd   : > { %v773_v35 = vadd.f32 %v758_v0, %v741_v34 }
  0xdf   : > { %v1532_v37 = vmax.f32 %v773_v35, 0.0  ;;  %v711_v38 = vpop.f32.mrf.mxu2 }
  0xe0   : > { %v712_v39 = vadd.f32 %v711_v38, %v683_v36  ;;  %v966_v38 = vld [vmem:[%s1635_s11 + $0x18] sm:$0xff] }
  0xe1   : > { %v918_v41 = vadd.f32 %v1532_v37, %v1513_v20 }
  0xe2   : > { %v745_v42 = vmul.f32 %v1504_v40, %v712_v39  ;;  %v1253_v40 = vmov 256.0  }
  0xe3   : > { %919 = vadd.xlane.f32.xlu0 %v918_v41  ;;  %1218 = vrcp.f32 %v1253_v40  ;;  %v986_v40 = vld [vmem:[%s1636_s12 + $0x10] sm:$0xff] }
  0xe4   : > { %v777_v43 = vadd.f32 %v1502_v15, %v745_v42  ;;  %v830_v15 = vld [vmem:[%s1629_s5] sm:$0xff] }
  0xe5   : > { %v868_v42 = vld [vmem:[#allocation2] sm:$0x1] }
  0xe6   : > { %v1538_v44 = vmax.f32 %v777_v43, 0.0  ;;  %v838_v43 = vld [vmem:[%s1630_s6] sm:$0xff] }
  0xe8   : > { %822 = vmatpush.msrb.mxu3 %v1538_v44  ;;  %v924_v32 = vadd.f32 %v1538_v44, %v1508_v12 }
  0xe9   : > { %v1219_v45 = vpop.eup %1218 }
  0xea   : > { %823 = vmatpush.msrb.mxu3 %v1524_v28  ;;  %925 = vadd.xlane.f32.xlu2 %v924_v32  ;;  %v928_v46 = vmul.f32 256.0, %v1219_v45  ;;  %vm932_vm1 = vweird.f32 %v1219_v45  ;;  %v848_v32 = vld [vmem:[%s1631_s7] sm:$0xff] }
  0xec   : > { %824 = vmatpush.msrb.mxu3 %v1532_v37  ;;  %v929_v47 = vsub.f32 1.0, %v928_v46  ;;  %v984_v46 = vld [vmem:[%s1636_s12] sm:$0xff] }
  0xee   : > { %825 = vmatpush.msrb.mxu3 %v1518_v25  ;;  %v930_v48 = vmul.f32 %v1219_v45, %v929_v47 }
  0xef   : > { %1186 = vmatmul.msk.f32.vlgmr.msrb.gmra.mxu3 %vm527_vm0, %v786_v27  ;;  %v964_v27 = vld [vmem:[%s1635_s11 + $0x8] sm:$0xff] }
  0xf0   : > { %v931_v49 = vadd.f32 %v1219_v45, %v930_v48 }
  0xf2   : > { %v933_v50 = vsel %vm932_vm1, %v1219_v45, %v931_v49  ;;  %v985_v45 = vld [vmem:[%s1636_s12 + $0x8] sm:$0xff] }
  0xf7   : > { %833 = vperm.xlu0 %1215, %v830_v15  }
 0x14e   : > { %v917_v51 = vpop.xlane.xlu2 %916 }
 0x14f   : > { %v934_v52 = vmul.f32 %v933_v50, %v917_v51  ;;  %v923_v53 = vpop.xlane.xlu1 %922 }
 0x150   : > { %v936_v58 = vmul.f32 %v933_v50, %v923_v53 }
 0x151   : > { %v942_v59 = vmul.f32 %v938_v54, %v934_v52 }
 0x152   : > { %v944_v63 = vmul.f32 %v940_v60, %v936_v58 }
 0x153   : > { %v947_v0 = vsel %vm946_vm2, %v942_v59, 0.0 }
 0x154   : > { %v950_v5 = vsel %vm946_vm2, %v944_v63, 0.0 }
 0x156   : > { %v920_v56 = vpop.xlane.xlu0 %919 }
 0x157   : > { %v935_v57 = vmul.f32 %v933_v50, %v920_v56  ;;  %v987_v56 = vld [vmem:[%s1636_s12 + $0x18] sm:$0xff] }
 0x159   : > { %v943_v61 = vmul.f32 %v939_v55, %v935_v57 }
 0x15b   : > { %v948_v62 = vsel %vm946_vm2, %v943_v61, 0.0 }
 0x15c   : > { %v949_v1 = vadd.f32 %v948_v62, %v947_v0 }
 0x15d   : > { %v926_v3 = vpop.xlane.xlu2 %925 }
 0x15e   : > { %v937_v4 = vmul.f32 %v933_v50, %v926_v3  ;;  %v951_v7 = vadd.f32 %v950_v5, %v949_v1 }
 0x160   : > { %v945_v6 = vmul.f32 %v941_v2, %v937_v4 }
 0x162   : > { %v952_v8 = vsel %vm946_vm2, %v945_v6, 0.0 }
 0x163   : > { %v953_v10 = vadd.f32 %v952_v8, %v951_v7 }
 0x165   : > { %v954_v11 = vrot.slane %v953_v10, 4 }
 0x167   : > { %v955_v13 = vadd.f32 %v954_v11, %v953_v10 }
 0x169   : > { %v956_v14 = vrot.slane %v955_v13, 2  ;;  %v1591_v15 = vpop.permute.xlu0 %833 }
 0x16b   : > { %v957_v16 = vadd.f32 %v956_v14, %v955_v13 }
 0x16d   : > { %v958_v17 = vrot.slane %v957_v16, 1 }
 0x16f   : > { %v959_v21 = vadd.f32 %v958_v17, %v957_v16 }
 0x171   : > { %v961_v22 = vadd.f32 %v960_v19, %v959_v21 }
 0x173   : > { %v962_v24 = vmax.f32 %v961_v22, 0.0 }
 0x175   : > { %v967_v29 = vperm.slane %v962_v24, 0 }
 0x177   : > { %v970_v30 = vmul.f32 %v967_v29, %v965_v26  ;;  %v969_v31 = vmul.f32 %v967_v29, %v964_v27  ;;  %v968_v33 = vmul.f32 %v967_v29, %v963_v9  ;;  %v971_v39 = vmul.f32 %v967_v29, %v966_v38 }
 0x179   : > { %v978_v34 = vsel %vm946_vm2, %v970_v30, 0.0  ;;  %v975_v35 = vsel %vm946_vm2, %v969_v31, 0.0  ;;  %v972_v36 = vsel %vm946_vm2, %v968_v33, 0.0  ;;  %v981_v41 = vsel %vm946_vm2, %v971_v39, 0.0  ;;  %v807_v30 = vpop.f32.mrf.mxu1 }
 0x17a   : > { %979 = vadd.xlane.f32.xlu1 %v978_v34  ;;  %976 = vadd.xlane.f32.xlu0 %v975_v35  ;;  %v827_v34 = vpop.f32.mrf.mxu3 }
 0x17b   : > { %973 = vadd.xlane.f32.xlu2 %v972_v36 }
 0x183   : > { %982 = vadd.xlane.f32.xlu2 %v981_v41 }
 0x18e   : > { %871 = vperm.xlu0 %1215, %v868_v42  }
 0x193   : > { %841 = vperm.xlu1 %1216, %v838_v43  }
 0x19b   : > { %851 = vperm.xlu2 %1217, %v848_v32   ;;  %v836_v32 = vmul.f32 %v1591_v15, %v807_v30 }
 0x1ed   : > { %v980_v47 = vpop.xlane.xlu1 %979  ;;  %v977_v48 = vpop.xlane.xlu0 %976 }
 0x1ee   : > { %v990_v49 = vadd.f32 %v986_v40, %v980_v47  ;;  %v989_v50 = vadd.f32 %v985_v45, %v977_v48  ;;  %v974_v51 = vpop.xlane.xlu2 %973  ;;  %v837_v47 = vmul.f32 %v1591_v15, %v827_v34 }
 0x1ef   : > { %v988_v52 = vadd.f32 %v984_v46, %v974_v51 }
 0x1f0   : > { %v1191_v53 = vmul.f32 -1.442695, %v990_v49  ;;  %v1190_v54 = vmul.f32 -1.442695, %v989_v50 }
 0x1f1   : > { %v1189_v55 = vmul.f32 -1.442695, %v988_v52 }
 0x1f2   : > { %1220 = vpow2.f32 %v1191_v53 }
 0x1f3   : > { %1222 = vpow2.f32 %v1190_v54 }
 0x1f4   : > { %1224 = vpow2.f32 %v1189_v55 }
 0x1f6   : > { %v983_v57 = vpop.xlane.xlu2 %982 }
 0x1f7   : > { %v991_v58 = vadd.f32 %v987_v56, %v983_v57 }
 0x1f8   : > { %v1221_v59 = vpop.eup %1220 }
 0x1f9   : > { %v1223_v60 = vpop.eup %1222  ;;  %v1006_v61 = vadd.f32 1.0, %v1221_v59  ;;  %v1192_v0 = vmul.f32 -1.442695, %v991_v58 }
 0x1fa   : > { %v1225_v62 = vpop.eup %1224  ;;  %v1005_v63 = vadd.f32 1.0, %v1223_v60 }
 0x1fb   : > { %1226 = vrcp.f32 %v1006_v61  ;;  %v1004_v1 = vadd.f32 1.0, %v1225_v62  ;;  %vm1043_vm3 = vweird.f32 %v1006_v61  ;;  %v1047_v10 = vand.u32 2147483647, %v1006_v61 }
 0x1fc   : > { %1228 = vrcp.f32 %v1005_v63  ;;  %v1032_v16 = vand.u32 2147483647, %v1005_v63  ;;  %v1049_v17 = vand.u32 2147483648, %v1006_v61  ;;  %v1034_v19 = vand.u32 2147483648, %v1005_v63 }
 0x1fd   : > { %1230 = vrcp.f32 %v1004_v1  ;;  %v1019_v26 = vand.u32 2147483648, %v1004_v1  ;;  %v1017_v29 = vand.u32 2147483647, %v1004_v1  ;;  %vm1028_vm7 = vweird.f32 %v1005_v63 }
 0x1fe   : > { %1232 = vpow2.f32 %v1192_v0  ;;  %vm1048_vm9 = vcmp.eq.f32.partialorder %v1047_v10, 8.507059e+37  ;;  %v1050_v33 = vor.u32 1.1754944e-38, %v1049_v17  ;;  %v1035_v35 = vor.u32 1.1754944e-38, %v1034_v19  ;;  %v852_v59 = vpop.permute.xlu2 %851 }
 0x1ff   : > { %vm1013_vm11 = vweird.f32 %v1004_v1  ;;  %vm1033_vm12 = vcmp.eq.f32.partialorder %v1032_v16, 8.507059e+37  ;;  %v1020_v43 = vor.u32 1.1754944e-38, %v1019_v26  ;;  %vm1018_vm14 = vcmp.eq.f32.partialorder %v1017_v29, 8.507059e+37 }
 0x201   : > { %v1227_v2 = vpop.eup %1226 }
 0x202   : > { %v1229_v3 = vpop.eup %1228  ;;  %v1039_v4 = vmul.f32 %v1227_v2, %v1006_v61  ;;  %vm1044_vm4 = vweird.f32 %v1227_v2 }
 0x203   : > { %v1231_v5 = vpop.eup %1230  ;;  %v1024_v6 = vmul.f32 %v1229_v3, %v1005_v63  ;;  %vm1029_vm5 = vweird.f32 %v1229_v3  ;;  %vm1045_vm8 = vmor %vm1043_vm3, %vm1044_vm4 }
 0x204   : > { %v1233_v7 = vpop.eup %1232  ;;  %v1040_v8 = vsub.f32 1.0, %v1039_v4  ;;  %v1009_v11 = vmul.f32 %v1231_v5, %v1004_v1  ;;  %vm1014_vm6 = vweird.f32 %v1231_v5  ;;  %vm1030_vm10 = vmor %vm1028_vm7, %vm1029_vm5 }
 0x205   : > { %v1007_v13 = vadd.f32 1.0, %v1233_v7  ;;  %v1025_v14 = vsub.f32 1.0, %v1024_v6  ;;  %v842_v39 = vpop.permute.xlu1 %841  ;;  %vm1015_vm13 = vmor %vm1013_vm11, %vm1014_vm6 }
 0x206   : > { %v1041_v21 = vmul.f32 %v1227_v2, %v1040_v8  ;;  %v1010_v22 = vsub.f32 1.0, %v1009_v11  ;;  %v844_v49 = vadd.f32 %v842_v39, %v836_v32  ;;  %v845_v51 = vadd.f32 %v842_v39, %v837_v47  ;;  %v872_v11 = vpop.permute.xlu0 %871 }
 0x207   : > { %1234 = vrcp.f32 %v1007_v13  ;;  %v1026_v24 = vmul.f32 %v1229_v3, %v1025_v14  ;;  %v1064_v53 = vand.u32 2147483648, %v1007_v13  ;;  %v1062_v56 = vand.u32 2147483647, %v1007_v13 }
 0x208   : > { %v1042_v27 = vadd.f32 %v1227_v2, %v1041_v21  ;;  %v1011_v9 = vmul.f32 %v1231_v5, %v1010_v22  ;;  %v846_v54 = vmax.f32 %v844_v49, 0.0  ;;  %v847_v57 = vmax.f32 %v845_v51, 0.0 }
 0x209   : > { %v1027_v31 = vadd.f32 %v1229_v3, %v1026_v24  ;;  %vm1058_vm0 = vweird.f32 %v1007_v13  ;;  %v1065_v60 = vor.u32 1.1754944e-38, %v1064_v53  ;;  %vm1063_vm2 = vcmp.eq.f32.partialorder %v1062_v56, 8.507059e+37 }
 0x20a   : > { %v1046_v36 = vsel %vm1045_vm8, %v1227_v2, %v1042_v27  ;;  %v1012_v38 = vadd.f32 %v1231_v5, %v1011_v9  ;;  %v854_v61 = vmul.f32 %v852_v59, %v846_v54  ;;  %v855_v62 = vmul.f32 %v852_v59, %v847_v57 }
 0x20b   : > { %v1031_v41 = vsel %vm1030_vm10, %v1229_v3, %v1027_v31  ;;  %v1051_v42 = vsel %vm1048_vm9, %v1050_v33, %v1046_v36  ;;  %v874_v16 = vperm.slane %v872_v11, 0 }
 0x20c   : > { %v1036_v40 = vsel %vm1033_vm12, %v1035_v35, %v1031_v41  ;;  %1082 = vperm.xlu2 %1217, %v1051_v42   ;;  %v1016_v45 = vsel %vm1015_vm13, %v1231_v5, %v1012_v38  ;;  %v856_v0 = vrot.slane %v854_v61, 4  ;;  %v862_v1 = vrot.slane %v855_v62, 4 }
 0x20d   : > { %v1235_v46 = vpop.eup %1234  ;;  %1077 = vperm.xlu0 %1215, %v1036_v40   ;;  %v1021_v48 = vsel %vm1018_vm14, %v1020_v43, %v1016_v45 }
 0x20e   : > { %1072 = vperm.xlu1 %1216, %v1021_v48   ;;  %v1054_v50 = vmul.f32 %v1235_v46, %v1007_v13  ;;  %vm1059_vm15 = vweird.f32 %v1235_v46  ;;  %v857_v2 = vadd.f32 %v856_v0, %v854_v61  ;;  %v863_v3 = vadd.f32 %v862_v1, %v855_v62 }
 0x20f   : > { %vm1060_vm1 = vmor %vm1058_vm0, %vm1059_vm15 }
 0x210   : > { %v1055_v52 = vsub.f32 1.0, %v1054_v50  ;;  %v858_v4 = vrot.slane %v857_v2, 2  ;;  %v864_v5 = vrot.slane %v863_v3, 2 }
 0x212   : > { %v1056_v55 = vmul.f32 %v1235_v46, %v1055_v52  ;;  %v859_v6 = vadd.f32 %v858_v4, %v857_v2  ;;  %v865_v7 = vadd.f32 %v864_v5, %v863_v3 }
 0x214   : > { %v1057_v58 = vadd.f32 %v1235_v46, %v1056_v55  ;;  %v860_v8 = vrot.slane %v859_v6, 1  ;;  %v866_v10 = vrot.slane %v865_v7, 1 }
 0x216   : > { %v1061_v15 = vsel %vm1060_vm1, %v1235_v46, %v1057_v58  ;;  %v861_v13 = vadd.f32 %v860_v8, %v859_v6  ;;  %v867_v14 = vadd.f32 %v866_v10, %v865_v7 }
 0x217   : > { %v1066_v63 = vsel %vm1063_vm2, %v1065_v60, %v1061_v15 }
 0x218   : > { %1087 = vperm.xlu1 %1216, %v1066_v63   ;;  %v875_v17 = vadd.f32 %v874_v16, %v861_v13  ;;  %v876_v19 = vadd.f32 %v874_v16, %v867_v14 }
 0x21a   : > { %v1187_v21 = vmul.f32 -1.442695, %v875_v17  ;;  %v1188_v22 = vmul.f32 -1.442695, %v876_v19 }
 0x21c   : > { %1236 = vpow2.f32 %v1187_v21 }
 0x21d   : > { %1238 = vpow2.f32 %v1188_v22 }
 0x222   : > { %v1237_v24 = vpop.eup %1236 }
 0x223   : > { %v1239_v26 = vpop.eup %1238  ;;  %v883_v27 = vadd.f32 1.0, %v1237_v24 }
 0x224   : > { %v884_v9 = vadd.f32 1.0, %v1239_v26 }
 0x225   : > { %1240 = vrcp.f32 %v883_v27  ;;  %vm890_vm5 = vweird.f32 %v883_v27  ;;  %v896_v43 = vand.u32 2147483648, %v883_v27  ;;  %v894_v40 = vand.u32 2147483647, %v883_v27 }
 0x226   : > { %1242 = vrcp.f32 %v884_v9  ;;  %v911_v42 = vand.u32 2147483648, %v884_v9  ;;  %vm905_vm6 = vweird.f32 %v884_v9  ;;  %v909_v32 = vand.u32 2147483647, %v884_v9 }
 0x227   : > { %v897_v48 = vor.u32 1.1754944e-38, %v896_v43  ;;  %vm895_vm10 = vcmp.eq.f32.partialorder %v894_v40, 8.507059e+37 }
 0x228   : > { %v912_v47 = vor.u32 1.1754944e-38, %v911_v42  ;;  %vm910_vm9 = vcmp.eq.f32.partialorder %v909_v32, 8.507059e+37 }
 0x22b   : > { %v1241_v29 = vpop.eup %1240 }
 0x22c   : > { %v1243_v30 = vpop.eup %1242  ;;  %v886_v33 = vmul.f32 %v1241_v29, %v883_v27  ;;  %vm891_vm3 = vweird.f32 %v1241_v29 }
 0x22d   : > { %v901_v31 = vmul.f32 %v1243_v30, %v884_v9  ;;  %vm906_vm4 = vweird.f32 %v1243_v30  ;;  %vm892_vm7 = vmor %vm890_vm5, %vm891_vm3 }
 0x22e   : > { %v887_v35 = vsub.f32 1.0, %v886_v33  ;;  %vm907_vm8 = vmor %vm905_vm6, %vm906_vm4 }
 0x22f   : > { %v902_v34 = vsub.f32 1.0, %v901_v31 }
 0x230   : > { %v888_v38 = vmul.f32 %v1241_v29, %v887_v35 }
 0x231   : > { %v903_v36 = vmul.f32 %v1243_v30, %v902_v34 }
 0x232   : > { %v889_v41 = vadd.f32 %v1241_v29, %v888_v38 }
 0x233   : > { %v904_v39 = vadd.f32 %v1243_v30, %v903_v36 }
 0x234   : > { %v893_v46 = vsel %vm892_vm7, %v1241_v29, %v889_v41 }
 0x235   : > { %v908_v45 = vsel %vm907_vm8, %v1243_v30, %v904_v39  ;;  %v898_v50 = vsel %vm895_vm10, %v897_v48, %v893_v46 }
 0x236   : > { %v913_v49 = vsel %vm910_vm9, %v912_v47, %v908_v45  ;;  %v1068_v53 = vadd.f32 1.0, %v898_v50 }
 0x237   : > { %v1069_v52 = vadd.f32 1.0, %v913_v49 }
 0x266   : > { %v1083_v51 = vpop.permute.xlu2 %1082 }
 0x267   : > { %v1094_v54 = vmul.f32 %v1083_v51, %v1511_v18  ;;  %v1095_v55 = vmul.f32 %v1083_v51, %v1524_v28 }
 0x269   : > { %v1102_v56 = vmul.f32 %v1094_v54, %v1068_v53  ;;  %v1103_v57 = vmul.f32 %v1095_v55, %v1069_v52 }
 0x26b   : > { %1110 = vst [vmem:[%s442_s30 + $0x20] sm:$0xff] %v1102_v56 }
 0x26c   : > { %1111 = vst [vmem:[%s442_s30 + $0x28] sm:$0xff] %v1103_v57 }
 0x27f   : > { %v1078_v58 = vpop.permute.xlu0 %1077 }
 0x280   : > { %v1092_v59 = vmul.f32 %v1078_v58, %v1513_v20  ;;  %v1093_v60 = vmul.f32 %v1078_v58, %v1532_v37  ;;  %v1073_v61 = vpop.permute.xlu1 %1072 }
 0x281   : > { %v1090_v15 = vmul.f32 %v1073_v61, %v1516_v23  ;;  %v1091_v18 = vmul.f32 %v1073_v61, %v1518_v25 }
 0x282   : > { %v1100_v62 = vmul.f32 %v1092_v59, %v1068_v53  ;;  %v1101_v28 = vmul.f32 %v1093_v60, %v1069_v52 }
 0x283   : > { %v1098_v63 = vmul.f32 %v1090_v15, %v1068_v53  ;;  %v1099_v0 = vmul.f32 %v1091_v18, %v1069_v52 }
 0x284   : > { %1108 = vst [vmem:[%s442_s30 + $0x10] sm:$0xff] %v1100_v62 }
 0x285   : > { %1109 = vst [vmem:[%s442_s30 + $0x18] sm:$0xff] %v1101_v28 }
 0x286   : > { %1106 = vst [vmem:[%s442_s30] sm:$0xff] %v1098_v63 }
 0x287   : > { %1107 = vst [vmem:[%s442_s30 + $0x8] sm:$0xff] %v1099_v0 }
 0x28a   : > { %v1088_v1 = vpop.permute.xlu1 %1087 }
 0x28b   : > { %v1096_v2 = vmul.f32 %v1088_v1, %v1508_v12  ;;  %v1097_v20 = vmul.f32 %v1088_v1, %v1538_v44 }
 0x28d   : > { %v1104_v3 = vmul.f32 %v1096_v2, %v1068_v53  ;;  %v1105_v37 = vmul.f32 %v1097_v20, %v1069_v52 }
 0x28f   : > { %1112 = vst [vmem:[%s442_s30 + $0x30] sm:$0xff] %v1104_v3 }
 0x290   : > { %1113 = vst [vmem:[%s442_s30 + $0x38] sm:$0xff] %v1105_v37 }
 0x291 PF: > { %s25_s27 = sadd.s32 1, %s1250_s27  }
 0x292   : > { %p22_p4 = scmp.ge.s32.totalorder %s25_s27, 4  }
 0x294   :  { %24 = sbr.rel (!%p22_p4) target bundleno = 3 (0x3), region = 102 }

</bundles_post_ra>
